<compile_context>
chip_gen: v7x
topology: tpu7x:2x2x1
jax: 0.10.0
libtpu: 0.0.40
codegen_flags: <defaults>
</compile_context>

<pallas_src>
import functools

import jax
import jax.numpy as jnp
from jax.experimental import pallas as pl
from jax.experimental.pallas import tpu as pltpu


SOFTPLUS_BETA = 100.0
SOFTPLUS_THRESHOLD = 20.0  # PyTorch default: if beta*x > 20, softplus(x) == x


def _round_up(x, m):
    return ((x + m - 1) // m) * m


def _gs_regress_kernel(x_ref, w_ref, b_ref, o_ref):
    """Fused softplus(beta=100) + block-diagonal dense on one lane-dense row tile.

    x_ref: (tm, PF)  packed input tile (original dtype)
    w_ref: (PF, PF)  block-diagonal weight, (in, out) layout, bf16, resident
    b_ref: (1, PF)   tiled bias, f32, resident
    o_ref: (tm, PF)  output tile (original dtype)
    """
    x = x_ref[...].astype(jnp.float32)          # upcast on-vreg, not in HBM
    bx = SOFTPLUS_BETA * x
    # softplus(x, beta) == max(x, 0) + log1p(exp(-|beta*x|)) / beta
    # exp argument <= 0, so no threshold branch is needed (differs from torch's
    # thresholded form by < 3e-11).  exp runs in bf16 (bf16 EUP on v6e/v7x;
    # abs error in sp <= ~2e-5); if v7x profiling shows the single EUP as the
    # binding slot, log1p can be moved to bf16 as well.
    e = jnp.exp((-jnp.abs(bx)).astype(jnp.bfloat16)).astype(jnp.float32)
    sp = jnp.maximum(x, 0.0) + jnp.log1p(e) * (1.0 / SOFTPLUS_BETA)
    # bf16 operands, f32 accumulation (matches TPU default-precision matmul).
    y = jnp.dot(sp.astype(jnp.bfloat16), w_ref[...],
                preferred_element_type=jnp.float32)
    o_ref[...] = (y + b_ref[...]).astype(o_ref.dtype)


@functools.lru_cache(maxsize=None)
def _default_pack():
    """pack=8 (PF=256) on 256-wide-MXU chips (v6e/v7x), else pack=4 (PF=128)."""
    try:
        kind = jax.devices()[0].device_kind.lower()
    except Exception:
        return 4
    if ("v6" in kind) or ("v7" in kind) or ("7x" in kind):
        return 8
    return 4


@functools.partial(jax.jit, static_argnames=("tile_m", "pack"))
def _gs_pointcloud_regress(x, weight, bias, *, tile_m, pack):
    orig_shape = x.shape
    orig_dtype = x.dtype
    F = orig_shape[-1]

    x2d = x.reshape(-1, F)                      # free view, dtype preserved
    M = x2d.shape[0]

    # Prefer shrinking `pack` (not below 4 -> still lane-dense) over padding.
    while pack > 4 and (M % pack):
        pack //= 2
    PF = pack * F

    M_pad = _round_up(M, pack)                  # at most pack-1 rows of padding
    if M_pad != M:
        x2d = jnp.pad(x2d, ((0, M_pad - M), (0, 0)))
    M_rows = M_pad // pack
    xp = x2d.reshape(M_rows, PF)                # contiguous -> free bitcast

    # Tile selection: big tiles amortize the ~0.35us/step overhead; keep >=2
    # grid steps (>=8 for large inputs) so v7x's two TensorCores both get work.
    tile_m = _round_up(max(int(tile_m), 16), 16)
    if M_rows <= 16:
        tile_rows = M_rows
    else:
        steps = 8 if M_rows >= 4096 else 2
        tile_rows = min(tile_m, _round_up(pl.cdiv(M_rows, steps), 16))
        tile_rows = min(tile_rows, M_rows)
    grid = (pl.cdiv(M_rows, tile_rows),)        # partial last block handled by Pallas

    # Block-diagonal weight applies W independently to each F-lane chunk.
    w_t = weight.astype(jnp.float32).T                              # (in, out)
    w_bd = jnp.kron(jnp.eye(pack, dtype=jnp.float32), w_t).astype(jnp.bfloat16)
    b_tiled = jnp.tile(bias.astype(jnp.float32), pack).reshape(1, PF)

    cost = pl.CostEstimate(
        flops=2 * M_rows * PF * PF,
        transcendentals=2 * M_rows * PF,
        bytes_accessed=int(2 * M_rows * PF * orig_dtype.itemsize
                           + PF * PF * 2 + PF * 4),
    )

    out = pl.pallas_call(
        _gs_regress_kernel,
        out_shape=jax.ShapeDtypeStruct((M_rows, PF), orig_dtype),
        grid_spec=pltpu.PrefetchScalarGridSpec(
            num_scalar_prefetch=0,
            grid=grid,
            in_specs=[
                pl.BlockSpec((tile_rows, PF), lambda i: (i, 0)),
                pl.BlockSpec((PF, PF), lambda i: (0, 0)),   # resident weight
                pl.BlockSpec((1, PF), lambda i: (0, 0)),    # resident bias
            ],
            out_specs=pl.BlockSpec((tile_rows, PF), lambda i: (i, 0)),
        ),
        compiler_params=pltpu.CompilerParams(
            dimension_semantics=("parallel",)),
        cost_estimate=cost,
    )(xp, w_bd, b_tiled)

    out = out.reshape(M_pad, F)                 # free view
    if M_pad != M:
        out = out[:M]                           # only fires if a pad fired
    return out.reshape(orig_shape)


def gs_pointcloud_regress(x, weight, bias, *, tile_m=2048, pack=None):
    """Apply softplus(beta=100) then Linear(F->F) to the last axis of x.

    x:      (..., F)    point-cloud features (any float dtype)
    weight: (F, F)      PyTorch layout (out_features, in_features)
    bias:   (F,)
    tile_m: max packed rows per grid step
    pack:   lane-packing factor; None -> auto (8 on v6e/v7x, 4 otherwise)
    """
    if pack is None:
        pack = _default_pack()
    return _gs_pointcloud_regress(x, weight, bias, tile_m=tile_m, pack=int(pack))


def _reference(x, weight, bias):
    """Pure-JAX f32 reference matching torch softplus(beta=100, threshold=20) + Linear."""
    x = x.astype(jnp.float32)
    bx = SOFTPLUS_BETA * x
    sp = jnp.where(
        bx > SOFTPLUS_THRESHOLD,
        x,
        jnp.log1p(jnp.exp(jnp.minimum(bx, SOFTPLUS_THRESHOLD))) / SOFTPLUS_BETA,
    )
    return sp @ weight.astype(jnp.float32).T + bias.astype(jnp.float32)


if __name__ == "__main__":
    # Example config: out_channels = (3, 1, 3, 4, 3, 2, 16) -> sum = 32
    out_channels = (3, 1, 3, 4, 3, 2, 16)
    F = sum(out_channels)                 # 32

    key = jax.random.PRNGKey(0)
    kx, kw, kb, kx2, kx3 = jax.random.split(key, 5)

    bound = 1.0 / jnp.sqrt(F)
    weight = jax.random.uniform(kw, (F, F), minval=-bound, maxval=bound,
                                dtype=jnp.float32)
    bias = jax.random.uniform(kb, (F,), minval=-bound, maxval=bound,
                              dtype=jnp.float32)

    # The kernel matmul uses bf16 operands with f32 accumulation (same as TPU
    # default matmul precision); tolerance vs the exact f32 reference reflects
    # bf16 operand rounding (~1e-3 relative typical, well inside 2e-2).
    TOL = dict(atol=2e-2, rtol=2e-2)

    # Case 1: aligned point count.
    B, N = 2, 64
    x = jax.random.normal(kx, (B, N, F), dtype=jnp.float32)
    y = jax.block_until_ready(gs_pointcloud_regress(x, weight, bias))
    assert y.shape == (B, N, F) and y.dtype == x.dtype
    assert jnp.allclose(y, _reference(x, weight, bias), **TOL), "mismatch (case 1)"

    # Case 2: ragged point count (exercises pack shrink + minimal pad + tail slice).
    B2, N2 = 3, 37
    x2 = jax.random.normal(kx2, (B2, N2, F), dtype=jnp.float32)
    y2 = jax.block_until_ready(gs_pointcloud_regress(x2, weight, bias))
    assert y2.shape == (B2, N2, F)
    assert jnp.allclose(y2, _reference(x2, weight, bias), **TOL), "mismatch (case 2)"

    # Case 3: bf16 input (exercises the in-kernel upcast; output stays bf16).
    x3 = jax.random.normal(kx3, (2, 48, F), dtype=jnp.float32).astype(jnp.bfloat16)
    y3 = jax.block_until_ready(gs_pointcloud_regress(x3, weight, bias))
    assert y3.shape == (2, 48, F) and y3.dtype == jnp.bfloat16
    y3_ref = _reference(x3.astype(jnp.float32), weight, bias)
    assert jnp.allclose(y3.astype(jnp.float32), y3_ref, **TOL), "mismatch (case 3)"

    print("KERNEL_OK")
</pallas_src>

<mosaic_0001>
module attributes {stable_mosaic.version = 11 : i64} {
  func.func @_gs_regress_kernel(%arg0: i32, %arg1: memref<16x128xf32, #tpu.memory_space<vmem>>, %arg2: memref<128x128xbf16, #tpu.memory_space<vmem>>, %arg3: memref<1x128xf32, #tpu.memory_space<vmem>>, %arg4: memref<16x128xf32, #tpu.memory_space<vmem>>) attributes {dimension_semantics = [#tpu.dimension_semantics<parallel>], iteration_bounds = array<i64: 2>, scalar_prefetch = 0 : i64, scratch_operands = 0 : i64, tpu.core_type = #tpu.core_type<tc>, window_params = [{transform_indices = @transform_0, window_bounds = array<i64: 16, 128>}, {pipeline_mode = #tpu.pipeline_mode<synchronous>, transform_indices = @transform_1, window_bounds = array<i64: 128, 128>}, {pipeline_mode = #tpu.pipeline_mode<synchronous>, transform_indices = @transform_2, window_bounds = array<i64: 1, 128>}, {transform_indices = @transform_3, window_bounds = array<i64: 16, 128>}]} {
    %c0 = arith.constant 0 : index
    %c0_0 = arith.constant 0 : index
    %0 = vector.load %arg1[%c0, %c0_0] : memref<16x128xf32, #tpu.memory_space<vmem>>, vector<16x128xf32>
    %cst = arith.constant 1.000000e+02 : f32
    %1 = vector.broadcast %cst : f32 to vector<16x128xf32>
    %2 = arith.mulf %1, %0 : vector<16x128xf32>
    %3 = math.absf %2 : vector<16x128xf32>
    %cst_1 = arith.constant 0.000000e+00 : f32
    %4 = vector.broadcast %cst_1 : f32 to vector<16x128xf32>
    %5 = arith.subf %4, %3 : vector<16x128xf32>
    %6 = arith.truncf %5 : vector<16x128xf32> to vector<16x128xbf16>
    %7 = math.exp %6 : vector<16x128xbf16>
    %8 = arith.extf %7 : vector<16x128xbf16> to vector<16x128xf32>
    %cst_2 = arith.constant 0.000000e+00 : f32
    %9 = vector.broadcast %cst_2 : f32 to vector<16x128xf32>
    %10 = arith.maximumf %0, %9 : vector<16x128xf32>
    %11 = math.log1p %8 : vector<16x128xf32>
    %cst_3 = arith.constant 0.00999999977 : f32
    %12 = vector.broadcast %cst_3 : f32 to vector<16x128xf32>
    %13 = arith.mulf %11, %12 : vector<16x128xf32>
    %14 = arith.addf %10, %13 : vector<16x128xf32>
    %15 = arith.truncf %14 : vector<16x128xf32> to vector<16x128xbf16>
    %c0_4 = arith.constant 0 : index
    %c0_5 = arith.constant 0 : index
    %16 = vector.load %arg2[%c0_4, %c0_5] : memref<128x128xbf16, #tpu.memory_space<vmem>>, vector<128x128xbf16>
    %cst_6 = arith.constant dense<0.000000e+00> : vector<16x128xf32>
    %17 = tpu.matmul %15, %16, %cst_6 {dimension_numbers = #tpu.dot_dimension_numbers<[1], [0], [0], [1], [0, 0, 1, 1], [], []>} : vector<16x128xbf16>, vector<128x128xbf16>, vector<16x128xf32> -> vector<16x128xf32>
    %c0_7 = arith.constant 0 : index
    %c0_8 = arith.constant 0 : index
    %18 = vector.load %arg3[%c0_7, %c0_8] : memref<1x128xf32, #tpu.memory_space<vmem>>, vector<1x128xf32>
    %19 = vector.broadcast %18 : vector<1x128xf32> to vector<16x128xf32>
    %20 = arith.addf %17, %19 : vector<16x128xf32>
    %c0_9 = arith.constant 0 : index
    %c0_10 = arith.constant 0 : index
    %21 = vector.load %arg4[%c0_9, %c0_10] : memref<16x128xf32, #tpu.memory_space<vmem>>, vector<16x128xf32>
    tpu.vector_store %arg4[%c0_9, %c0_10], %20 {strides = array<i32>} : memref<16x128xf32, #tpu.memory_space<vmem>>, vector<16x128xf32>,
    return
  }
  func.func @transform_0(%arg0: i32) -> (i32, i32) {
    %c0_i32 = arith.constant 0 : i32
    %c0_i32_0 = arith.constant 0 : i32
    return %arg0, %c0_i32 : i32, i32
  }
  func.func @transform_1(%arg0: i32) -> (i32, i32) {
    %c0_i32 = arith.constant 0 : i32
    %c0_i32_0 = arith.constant 0 : i32
    %c0_i32_1 = arith.constant 0 : i32
    return %c0_i32, %c0_i32_0 : i32, i32
  }
  func.func @transform_2(%arg0: i32) -> (i32, i32) {
    %c0_i32 = arith.constant 0 : i32
    %c0_i32_0 = arith.constant 0 : i32
    %c0_i32_1 = arith.constant 0 : i32
    return %c0_i32, %c0_i32_0 : i32, i32
  }
  func.func @transform_3(%arg0: i32) -> (i32, i32) {
    %c0_i32 = arith.constant 0 : i32
    %c0_i32_0 = arith.constant 0 : i32
    return %arg0, %c0_i32 : i32, i32
  }
}

</mosaic_0001>

<bundles_post_ra>
// kernel: tile.8
= control target key start
LH: loop header
LB: loop body
LE: loop exit
PB: predicated region body
PF: predicated region fallthrough
CT: control target
= control target key end

     0   :  { %s22_s0 = inlined_call_operand.vmem [shape: f32[32], index: 0, kind: input, shape index: {}]   ;;  %s23_s1 = inlined_call_operand.vmem [shape: f32[4,32], index: 1, kind: output, shape index: {}]  }
   0x1   :  { %v4_v0 = vld [vmem:[%s22_s0] ss:$0 sm:$0xff] }
   0x2   :  { %5 = vst [vmem:[%s23_s1] sm:$0xf] %v4_v0 }

// kernel: tile.9
= control target key start
LH: loop header
LB: loop body
LE: loop exit
PB: predicated region body
PF: predicated region fallthrough
CT: control target
= control target key end

     0   :  { %vm7_vm0 = vcmask 261120   ;;  %s37_s8 = smov 32   ;;  %s38_s9 = smov 64   ;;  %vm13_vm1 = vcmask 1048320   ;;  %vm19_vm2 = vcmask 785920   ;;  %vm25_vm3 = vcmask 523520   ;;  %s55_s0 = inlined_call_operand.vmem [shape: f32[4,32], index: 0, kind: input, shape index: {}]   ;;  %s56_s1 = inlined_call_operand.vmem [shape: f32[1,128], index: 1, kind: output, shape index: {}]  }
   0x1   :  { %v4_v0 = vld [vmem:[%s55_s0] sm:$0xf]  ;;  %s36_s0 = smov 96  }
   0x2   :  { %5 = vst [vmem:[#allocation1] sm:$0xf] %v4_v0 }
   0x9   :  { %v10_v1 = vld [vmem:[#allocation1 + $0x3] sm:$0x1]   ;;  %v22_v2 = vld [vmem:[#allocation1 + $0x1] sm:$0x1]   ;;  %v6_v3 = vld [vmem:[#allocation1] sm:$0x1]  }
   0xa   :  { %11 = vrot.lane.b32.xlu0 %v10_v1, %s36_s0  ;;  %23 = vrot.lane.b32.xlu1 %v22_v2, %s37_s8  ;;  %v16_v4 = vld [vmem:[#allocation1 + $0x2] sm:$0x1]   ;;  %8 = vst.msk [vmem:[#allocation0] sm:$0x1] %vm7_vm0, %v6_v3  }
   0xe   :  { %17 = vrot.lane.b32.xlu0 %v16_v4, %s38_s9 }
  0x7c   :  { %v12_v5 = vpop.permute.xlu0 %11   ;;  %v24_v6 = vpop.permute.xlu1 %23  }
  0x7d   :  { %14 = vst.msk [vmem:[#allocation0] sm:$0x1] %vm13_vm1, %v12_v5  }
  0x80   :  { %v18_v7 = vpop.permute.xlu0 %17  }
  0x81   :  { %20 = vst.msk [vmem:[#allocation0] sm:$0x1] %vm19_vm2, %v18_v7  }
  0x82   :  { %26 = vst.msk [vmem:[#allocation0] sm:$0x1] %vm25_vm3, %v24_v6  }
  0x89   :  { %v30_v8 = vld [vmem:[#allocation0] sm:$0x1] }
  0x8a   :  { %32 = vst [vmem:[%s56_s1] sm:$0x1] %v30_v8 }

// kernel: _gs_pointcloud_regress.1
= control target key start
LH: loop header
LB: loop body
LE: loop exit
PB: predicated region body
PF: predicated region fallthrough
CT: control target
= control target key end

     0   :  { %s487_s12 = smov 0   ;;  %s538_s0 = inlined_call_operand.vmem [shape: f32[32,128], index: 0, kind: input, shape index: {}]   ;;  %s539_s1 = inlined_call_operand.vmem [shape: bf16[128,128], index: 1, kind: input, shape index: {}]   ;;  %s540_s2 = inlined_call_operand.vmem [shape: f32[1,128], index: 2, kind: input, shape index: {}]   ;;  %s541_s3 = inlined_call_operand.vmem [shape: f32[32,128], index: 3, kind: output, shape index: {}]  }
   0x1 LB: > { %s384_s13 = sadd.s32 4294967295, %s463_s12   ;;  %p388_p0 = scmp.ge.s32.totalorder %s463_s12, 1  ;;  %s463_s12 = sphi %s487_s12, %s13_s12  }
   0x2   : > { %p138_p1 = scmp.lt.s32.totalorder %s463_s12, 3 }
   0x4   : > { %p139_p2 = pnand %p388_p0, %p138_p1 }
   0x5   : > { %v443_v0 = vld [vmem:[%s539_s1] sm:$0xff] (!%p139_p2)   ;;  %v465_v1 = vmov (!%p139_p2), 0.0   ;;  %v444_v2 = vld [vmem:[%s539_s1 + $0x8] sm:$0xff] (!%p139_p2)   ;;  %vm466_vm0 = vmmov (!%p139_p2), 0   ;;  %s389_s18 = sshll.u32 (!%p139_p2), %s384_s13, 1  ;;  %v445_v3 = vld [vmem:[%s539_s1 + $0x10] sm:$0xff] (!%p139_p2)  }
   0x6   : > { %142 = sbr.rel (%p139_p2) target bundleno = 281 (0x119), region = 32  ;;  %413 = vmatprep.subr.bf16.mxu0 (!%p139_p2), %v465_v1  ;;  %429 = vmatprep.mubr.msk.bf16.mxu0 (!%p139_p2), %vm466_vm0, %v465_v1  ;;  %p163_p3 = scmp.lt.s32.totalorder (!%p139_p2), %s389_s18, 3  ;;  %v446_v6 = vld [vmem:[%s539_s1 + $0x18] sm:$0xff] (!%p139_p2)   ;;  %v447_v11 = vld [vmem:[%s539_s1 + $0x20] sm:$0xff] (!%p139_p2)   ;;  %v448_v15 = vld [vmem:[%s539_s1 + $0x28] sm:$0xff] (!%p139_p2)  }
   0x7   : > { %414 = vmatpush3.bf16.msra.mxu0 (!%p139_p2), %v443_v0  ;;  %v449_v17 = vld [vmem:[%s539_s1 + $0x30] sm:$0xff] (!%p139_p2)   ;;  %v450_v18 = vld [vmem:[%s539_s1 + $0x38] sm:$0xff] (!%p139_p2)   ;;  %v393_v45 = vld [vmem:[%s540_s2] ss:$0 sm:$0xff] (!%p139_p2) }
   0x8   : > { %415 = vmatprep.subr.bf16.mxu0 (!%p139_p2), %v465_v1 }
   0xb   : > { %416 = vmatpush3.bf16.msra.mxu0 (!%p139_p2), %v444_v2 }
   0xc   : > { %417 = vmatprep.subr.bf16.mxu0 (!%p139_p2), %v465_v1 }
   0xd   : > { %s543_s18 = smov (!%p163_p3, %s389_s18), 3 }
   0xe   : > { %s390_s21 = sshll.u32 %s543_s18, 3 }
   0xf   : > { %s166_s24 = scalar_lea.vmem %s538_s0, %s390_s21  ;;  %418 = vmatpush3.bf16.msra.mxu0 %v445_v3  ;;  %s172_s13 = scalar_lea.vmem %s541_s3, %s390_s21 }
  0x10   : > { %v175_v4 = vld [vmem:[%s166_s24] sm:$0xff]  ;;  %v176_v5 = vld [vmem:[%s166_s24 + $0x8] sm:$0xff]  ;;  %419 = vmatprep.subr.bf16.mxu0 %v465_v1 }
  0x11   : > { %v177_v7 = vmul.f32 100.0, %v175_v4  ;;  %v178_v8 = vmul.f32 100.0, %v176_v5  ;;  %v189_v35 = vmax.f32 %v175_v4, 0.0  ;;  %v190_v37 = vmax.f32 %v176_v5, 0.0 }
  0x13   : > { %v179_v9 = vand.u32 2147483647, %v177_v7  ;;  %v180_v10 = vand.u32 2147483647, %v178_v8  ;;  %420 = vmatpush3.bf16.msra.mxu0 %v446_v6 }
  0x14   : > { %421 = vmatprep.subr.bf16.mxu0 %v465_v1 }
  0x15   : > { %v181_v12 = vsub.f32 0.0, %v179_v9  ;;  %v182_v13 = vsub.f32 0.0, %v180_v10 }
  0x17   : > { %v183_v14 = vpack.c.bf16 %v182_v13, %v181_v12  ;;  %422 = vmatpush3.bf16.msra.mxu0 %v447_v11 }
  0x18   : > { %423 = vmatprep.subr.bf16.mxu0 %v465_v1 }
  0x19   : > { %v185_v16 = vmul.bf16 1069105081, %v183_v14 }
  0x1b   : > { %451 = vpow.bf16 %v185_v16  ;;  %424 = vmatpush3.bf16.msra.mxu0 %v448_v15 }
  0x1c   : > { %425 = vmatprep.subr.bf16.mxu0 %v465_v1 }
  0x1f   : > { %426 = vmatpush3.bf16.msra.mxu0 %v449_v17 }
  0x20   : > { %427 = vmatprep.subr.bf16.mxu0 %v465_v1 }
  0x23   : > { %428 = vmatpush3.bf16.msra.mxu0 %v450_v18 }
  0x26   : > { %v452_v19 = vpop.eup %451 }
  0x27   : > { %v187_v20 = vunpack.c.l.bf16 %v452_v19  ;;  %v188_v21 = vunpack.c.h.bf16 %v452_v19 }
  0x29   : > { %v191_v22 = vadd.f32 1.0, %v187_v20  ;;  %v200_v23 = vadd.f32 1.0, %v188_v21  ;;  %v194_v24 = vmul.f32 -0.5, %v187_v20  ;;  %v203_v25 = vmul.f32 -0.5, %v188_v21 }
  0x2a   : > { %v197_v27 = vand.u32 2147483647, %v187_v20  ;;  %v206_v29 = vand.u32 2147483647, %v188_v21 }
  0x2b   : > { %453 = vlog2.f32 %v191_v22  ;;  %v195_v26 = vadd.f32 1.0, %v194_v24  ;;  %v204_v28 = vadd.f32 1.0, %v203_v25 }
  0x2c   : > { %455 = vlog2.f32 %v200_v23  ;;  %vm198_vm1 = vcmp.lt.f32.partialorder %v197_v27, 0.0004427343  ;;  %vm207_vm2 = vcmp.lt.f32.partialorder %v206_v29, 0.0004427343 }
  0x2d   : > { %v196_v30 = vmul.f32 %v195_v26, %v187_v20  ;;  %v205_v32 = vmul.f32 %v204_v28, %v188_v21 }
  0x35   : > { %v454_v31 = vpop.eup %453 }
  0x36   : > { %v456_v33 = vpop.eup %455  ;;  %v193_v34 = vmul.f32 0.6931472, %v454_v31 }
  0x37   : > { %v202_v36 = vmul.f32 0.6931472, %v456_v33 }
  0x38   : > { %v199_v38 = vsel %vm198_vm1, %v196_v30, %v193_v34 }
  0x39   : > { %v208_v39 = vsel %vm207_vm2, %v205_v32, %v202_v36  ;;  %v209_v40 = vmul.f32 0.01, %v199_v38 }
  0x3a   : > { %v210_v41 = vmul.f32 0.01, %v208_v39 }
  0x3b   : > { %v211_v42 = vadd.f32 %v209_v40, %v189_v35 }
  0x3c   : > { %v212_v43 = vadd.f32 %v210_v41, %v190_v37 }
  0x3e   : > { %v213_v44 = vpack.c.bf16 %v212_v43, %v211_v42 }
  0x40   : > { %430 = vmatmul.mubr.bf16.vlgmr.msra.gmra.mrb[0].mxu0 %v213_v44 }
 0x113   : > { %v319_v46 = vpop.f32.mrb[0].mxu0 }
 0x114   : > { %v320_v47 = vadd.f32 %v393_v45, %v319_v46  ;;  %v431_v48 = vpop.f32.mrb[1].mxu0 }
 0x115   : > { %v322_v49 = vpop.f32.mrb[2].mxu0 }
 0x116   : > { %326 = vst [vmem:[%s172_s13] sm:$0xff] %v320_v47  ;;  %v323_v50 = vadd.f32 %v393_v45, %v322_v49  ;;  %v432_v51 = vpop.f32.mrb[3].mxu0 }
 0x118   : > { %327 = vst [vmem:[%s172_s13 + $0x8] sm:$0xff] %v323_v50 }
 0x119 PF: > { %s13_s12 = sadd.s32 1, %s463_s12  }
 0x11a   : > { %p10_p4 = scmp.ge.s32.totalorder %s13_s12, 4  }
 0x11c   :  { %12 = sbr.rel (!%p10_p4) target bundleno = 1 (0x1), region = 62 }

</bundles_post_ra>
